<compile_context>
chip_gen: v7x
topology: tpu7x:2x2x1
jax: 0.10.0
libtpu: 0.0.40
codegen_flags: <defaults>
</compile_context>

<pallas_src>
import jax
import jax.numpy as jnp
from jax.experimental import pallas as pl
from jax.experimental.pallas import tpu as pltpu


def _logreg_kernel(x_ref, w_ref, b_ref, o_ref):
    # x_ref: (TN, K)  w_ref: (K, Cout)  b_ref: (1, Cout)  o_ref: (TN, Cout)
    acc = jnp.dot(x_ref[...], w_ref[...], preferred_element_type=jnp.float32)
    o_ref[...] = (acc + b_ref[...]).astype(o_ref.dtype)


def _vmem_capacity_bytes():
    try:
        return int(pltpu.get_tpu_info().vmem_capacity_bytes)
    except Exception:
        return 64 << 20  # conservative fallback (v7x per-TensorCore VMEM)


def _choose_row_tile(M, bytes_per_row, resident_bytes, budget_bytes):
    """Row tile: as big as the VMEM budget allows, multiple of 8, and small
    enough that large problems get a multi-step grid."""
    if M <= 8:
        return M  # full-extent block is always legal
    avail = max(budget_bytes - resident_bytes, 8 * bytes_per_row)
    tn = avail // bytes_per_row
    if M >= 32:
        tn = min(tn, M // 4)  # guarantee >= 4 grid steps on large inputs
    tn = min(tn, M)
    if tn >= M:
        return M
    if tn >= 512:
        tn = (tn // 256) * 256  # keep HBM DMA bursts long / unmasked
    else:
        tn = (tn // 8) * 8      # (8, 128) sublane constraint
    return max(8, int(tn))


def logreg_forward(X, W, b):
    """[X, 1] @ W.T + b without materializing the ones column.

    X: (N, F) float32;  W: (C, F+1) float32;  b: (C,) float32.
    Returns (N, C) float32 logits.
    """
    N, F = X.shape
    C, Fp1 = W.shape
    assert Fp1 == F + 1, "W must have num_feats + 1 columns"

    # Fold the constant-ones feature into the bias (exactly equivalent math):
    #   [X, 1] @ W.T + b == X @ W[:, :F].T + (b + W[:, F])
    W_t = W[:, :F].T.astype(jnp.float32)              # (F, C)
    b_eff = (b + W[:, F]).reshape(1, C).astype(jnp.float32)

    # Lane densification for narrow feature dims.
    r = 1
    if F < 128 and 128 % F == 0 and N % (128 // F) == 0:
        r = 128 // F

    if r > 1:
        M, K, Cout = N // r, 128, r * C
        x_in = X.reshape(M, K)                                # free reshape
        w_in = jnp.kron(jnp.eye(r, dtype=jnp.float32), W_t)   # (128, r*C) block-diag
        b_in = jnp.tile(b_eff, (1, r))                        # (1, r*C)
    else:
        M, K, Cout = N, F, C
        x_in, w_in, b_in = X, W_t, b_eff

    # --- Adaptive, generation-aware tiling over the row axis. ---
    cap = _vmem_capacity_bytes()
    budget = (24 << 20) if cap <= (64 << 20) else (48 << 20)
    itemsize = 4
    bytes_per_row = (K + Cout) * itemsize * 2          # X + out, double-buffered
    resident = (K * Cout + Cout) * itemsize * 2        # W + bias (2 buffers)
    tn = _choose_row_tile(M, bytes_per_row, resident, budget)
    grid = (pl.cdiv(M, tn),)

    working_set = resident + tn * bytes_per_row
    vmem_limit = int(min(cap, max(working_set * 5 // 4, 16 << 20)))

    cost = pl.CostEstimate(
        flops=2 * M * K * Cout,
        transcendentals=0,
        bytes_accessed=itemsize * (M * K + K * Cout + Cout + M * Cout),
    )

    out = pl.pallas_call(
        _logreg_kernel,
        out_shape=jax.ShapeDtypeStruct((M, Cout), jnp.float32),
        grid=grid,
        in_specs=[
            pl.BlockSpec((tn, K), lambda i: (i, 0)),     # X: streamed per tile
            pl.BlockSpec((K, Cout), lambda i: (0, 0)),   # W: resident in VMEM
            pl.BlockSpec((1, Cout), lambda i: (0, 0)),   # bias: resident
        ],
        out_specs=pl.BlockSpec((tn, Cout), lambda i: (i, 0)),
        compiler_params=pltpu.CompilerParams(
            dimension_semantics=("parallel",),  # rows independent; dual-TC on v7x
            vmem_limit_bytes=vmem_limit,
        ),
        cost_estimate=cost,
    )(x_in, w_in, b_in)

    return out.reshape(N, C)


def _reference(X, W, b):
    X_aug = jnp.concatenate([X, jnp.ones((X.shape[0], 1), jnp.float32)], axis=1)
    return X_aug @ W.T + b


if __name__ == "__main__":
    # Module-consistent small shapes: batch=8 samples, 32 features, 4 classes.
    batch, num_feats, num_classes = 8, 32, 4

    key = jax.random.PRNGKey(0)
    kx, kw, kb, kx2 = jax.random.split(key, 4)

    X = jax.random.normal(kx, (batch, num_feats), dtype=jnp.float32)

    # Deterministic nn.Linear-style init: U(-1/sqrt(fan_in), 1/sqrt(fan_in)),
    # fan_in = num_feats + 1 (the augmented input dimension).
    fan_in = num_feats + 1
    bound = 1.0 / jnp.sqrt(jnp.float32(fan_in))
    W = jax.random.uniform(kw, (num_classes, fan_in), dtype=jnp.float32,
                           minval=-bound, maxval=bound)
    b = jax.random.uniform(kb, (num_classes,), dtype=jnp.float32,
                           minval=-bound, maxval=bound)

    out = jax.block_until_ready(logreg_forward(X, W, b))
    ref = _reference(X, W, b)
    assert out.shape == (batch, num_classes)
    assert jnp.allclose(out, ref, atol=1e-5, rtol=1e-5)

    # Also exercise the multi-step grid path (lane-dense M=32 rows -> 4 steps).
    X_big = jax.random.normal(kx2, (128, num_feats), dtype=jnp.float32)
    out_big = jax.block_until_ready(logreg_forward(X_big, W, b))
    ref_big = _reference(X_big, W, b)
    assert out_big.shape == (128, num_classes)
    assert jnp.allclose(out_big, ref_big, atol=1e-5, rtol=1e-5)

    print("KERNEL_OK")
</pallas_src>

<mosaic_0001>
module attributes {stable_mosaic.version = 11 : i64} {
  func.func @_logreg_kernel(%arg0: i32, %arg1: memref<2x128xf32, #tpu.memory_space<vmem>>, %arg2: memref<128x16xf32, #tpu.memory_space<vmem>>, %arg3: memref<1x16xf32, #tpu.memory_space<vmem>>, %arg4: memref<2x16xf32, #tpu.memory_space<vmem>>) attributes {dimension_semantics = [#tpu.dimension_semantics<parallel>], iteration_bounds = array<i64: 1>, scalar_prefetch = 0 : i64, scratch_operands = 0 : i64, tpu.core_type = #tpu.core_type<tc>, window_params = [{transform_indices = @transform_0, window_bounds = array<i64: 2, 128>}, {pipeline_mode = #tpu.pipeline_mode<synchronous>, transform_indices = @transform_1, window_bounds = array<i64: 128, 16>}, {pipeline_mode = #tpu.pipeline_mode<synchronous>, transform_indices = @transform_2, window_bounds = array<i64: 1, 16>}, {transform_indices = @transform_3, window_bounds = array<i64: 2, 16>}]} {
    %c0 = arith.constant 0 : index
    %c0_0 = arith.constant 0 : index
    %0 = vector.load %arg1[%c0, %c0_0] : memref<2x128xf32, #tpu.memory_space<vmem>>, vector<2x128xf32>
    %c0_1 = arith.constant 0 : index
    %c0_2 = arith.constant 0 : index
    %1 = vector.load %arg2[%c0_1, %c0_2] : memref<128x16xf32, #tpu.memory_space<vmem>>, vector<128x16xf32>
    %cst = arith.constant dense<0.000000e+00> : vector<2x16xf32>
    %2 = tpu.matmul %0, %1, %cst {dimension_numbers = #tpu.dot_dimension_numbers<[1], [0], [0], [1], [0, 0, 1, 1], [], []>} : vector<2x128xf32>, vector<128x16xf32>, vector<2x16xf32> -> vector<2x16xf32>
    %c0_3 = arith.constant 0 : index
    %c0_4 = arith.constant 0 : index
    %3 = vector.load %arg3[%c0_3, %c0_4] : memref<1x16xf32, #tpu.memory_space<vmem>>, vector<1x16xf32>
    %4 = vector.broadcast %3 : vector<1x16xf32> to vector<2x16xf32>
    %5 = arith.addf %2, %4 : vector<2x16xf32>
    %c0_5 = arith.constant 0 : index
    %c0_6 = arith.constant 0 : index
    %6 = vector.load %arg4[%c0_5, %c0_6] : memref<2x16xf32, #tpu.memory_space<vmem>>, vector<2x16xf32>
    tpu.vector_store %arg4[%c0_5, %c0_6], %5 {strides = array<i32>} : memref<2x16xf32, #tpu.memory_space<vmem>>, vector<2x16xf32>,
    return
  }
  func.func @transform_0(%arg0: i32) -> (i32, i32) {
    %c0_i32 = arith.constant 0 : i32
    %c0_i32_0 = arith.constant 0 : i32
    return %arg0, %c0_i32 : i32, i32
  }
  func.func @transform_1(%arg0: i32) -> (i32, i32) {
    %c0_i32 = arith.constant 0 : i32
    %c0_i32_0 = arith.constant 0 : i32
    %c0_i32_1 = arith.constant 0 : i32
    return %c0_i32, %c0_i32_0 : i32, i32
  }
  func.func @transform_2(%arg0: i32) -> (i32, i32) {
    %c0_i32 = arith.constant 0 : i32
    %c0_i32_0 = arith.constant 0 : i32
    %c0_i32_1 = arith.constant 0 : i32
    return %c0_i32, %c0_i32_0 : i32, i32
  }
  func.func @transform_3(%arg0: i32) -> (i32, i32) {
    %c0_i32 = arith.constant 0 : i32
    %c0_i32_0 = arith.constant 0 : i32
    return %arg0, %c0_i32 : i32, i32
  }
}

</mosaic_0001>

<bundles_post_ra>
// kernel: tpu_custom_call.1
= control target key start
LH: loop header
LB: loop body
LE: loop exit
PB: predicated region body
PF: predicated region fallthrough
CT: control target
= control target key end

     0   :  { %v230_v3 = vmov 0.0|0.0   ;;  %vm231_vm0 = vmmov 0   ;;  %v232_v6 = vmov 0.0   ;;  %s320_s0 = inlined_call_operand.vmem [shape: f32[2,128], index: 0, kind: input, shape index: {}]   ;;  %s321_s1 = inlined_call_operand.vmem [shape: f32[128,16], index: 1, kind: input, shape index: {}]   ;;  %s322_s2 = inlined_call_operand.vmem [shape: f32[1,16], index: 2, kind: input, shape index: {}]   ;;  %s323_s3 = inlined_call_operand.hbm [shape: f32[2,16], index: 3, kind: output, shape index: {}]  }
   0x1   :  { %v16_v0 = vld [vmem:[%s321_s1] sm:$0xff]  ;;  %v17_v1 = vld [vmem:[%s321_s1 + $0x8] sm:$0xff]  ;;  %v18_v2 = vld [vmem:[%s321_s1 + $0x10] sm:$0xff]  ;;  %178 = vmatprep.subr.bf16.mxu0 %v230_v3  ;;  %175 = vmatprep.mubr.msk.f32.mxu0 %vm231_vm0, %v232_v6 }
   0x2   :  { %v179_v4 = vpack.c.bf16 %v17_v1, %v16_v0  ;;  %v19_v5 = vld [vmem:[%s321_s1 + $0x18] sm:$0xff]  ;;  %v20_v8 = vld [vmem:[%s321_s1 + $0x20] sm:$0xff]  ;;  %v21_v9 = vld [vmem:[%s321_s1 + $0x28] sm:$0xff] }
   0x3   :  { %v182_v7 = vpack.c.bf16 %v19_v5, %v18_v2 }
   0x4   :  { %180 = vmatpush3.bf16.msra.mxu0 %v179_v4 }
   0x5   :  { %181 = vmatprep.subr.bf16.mxu0 %v230_v3 }
   0x6   :  { %8 = vsyncpa [#allocation3], 0  ;;  %v185_v10 = vpack.c.bf16 %v21_v9, %v20_v8  ;;  %v22_v11 = vld [vmem:[%s321_s1 + $0x30] sm:$0xff]  ;;  %v23_v12 = vld [vmem:[%s321_s1 + $0x38] sm:$0xff]  ;;  %s233_s21 = smov [#allocation2]   ;;  %vm109_vm1 = vcmask 123904  }
   0x7   :  { %v188_v13 = vpack.c.bf16 %v23_v12, %v22_v11  ;;  %v24_v14 = vld [vmem:[%s321_s1 + $0x40] sm:$0xff]  ;;  %v25_v15 = vld [vmem:[%s321_s1 + $0x48] sm:$0xff]  ;;  %v26_v17 = vld [vmem:[%s321_s1 + $0x50] sm:$0xff]  ;;  %s117_s22 = sshll.u32 %s233_s21, 4  ;;  %s118_s22 = int_to_ptr.vmem [resolvable:$true] %s117_s22 }
   0x8   :  { %183 = vmatpush3.bf16.msra.mxu0 %v182_v7  ;;  %v191_v16 = vpack.c.bf16 %v25_v15, %v24_v14  ;;  %v27_v18 = vld [vmem:[%s321_s1 + $0x58] sm:$0xff]  ;;  %v28_v20 = vld [vmem:[%s321_s1 + $0x60] sm:$0xff]  ;;  %v29_v21 = vld [vmem:[%s321_s1 + $0x68] sm:$0xff]  ;;  %p211_p1 = scmp.lt.s32.totalorder %s118_s22, %s118_s22 }
   0x9   :  { %184 = vmatprep.subr.bf16.mxu0 %v230_v3  ;;  %v194_v19 = vpack.c.bf16 %v27_v18, %v26_v17  ;;  %v197_v22 = vpack.c.bf16 %v29_v21, %v28_v20  ;;  %v30_v23 = vld [vmem:[%s321_s1 + $0x70] sm:$0xff]  ;;  %v31_v24 = vld [vmem:[%s321_s1 + $0x78] sm:$0xff]  ;;  %v15_v26 = vld [vmem:[%s320_s0] sm:$0x3]  ;;  %s206_s1 = scalar_lea.vmem %s118_s22, 32 }
   0xa   :  { %v200_v25 = vpack.c.bf16 %v31_v24, %v30_v23  ;;  %v125_v27 = vld [vmem:[%s322_s2] ss:$0 sm:$0xff]  ;;  %p207_p0 = scmp.ne.s32.totalorder %s118_s22, %s206_s1  ;;  %p212_p2 = scmp.lt.s32.totalorder %s206_s1, %s206_s1 }
   0xc   :  { %186 = vmatpush3.bf16.msra.mxu0 %v185_v10  ;;  %p213_p3 = por %p212_p2, %p211_p1 }
   0xd   :  { %187 = vmatprep.subr.bf16.mxu0 %v230_v3 }
   0xe   :  { %p214_p4 = pnand %p213_p3, %p207_p0 }
  0x10   :  { %189 = vmatpush3.bf16.msra.mxu0 %v188_v13 }
  0x11   :  { %190 = vmatprep.subr.bf16.mxu0 %v230_v3 }
  0x14   :  { %192 = vmatpush3.bf16.msra.mxu0 %v191_v16 }
  0x15   :  { %193 = vmatprep.subr.bf16.mxu0 %v230_v3 }
  0x18   :  { %195 = vmatpush3.bf16.msra.mxu0 %v194_v19 }
  0x19   :  { %196 = vmatprep.subr.bf16.mxu0 %v230_v3 }
  0x1c   :  { %198 = vmatpush3.bf16.msra.mxu0 %v197_v22 }
  0x1d   :  { %199 = vmatprep.subr.bf16.mxu0 %v230_v3 }
  0x20   :  { %201 = vmatpush3.bf16.msra.mxu0 %v200_v25 }
  0x23   :  { %176 = vmatmul.mubr.f32.vlgmr.msra.gmra.mrb[0].mxu0 %v15_v26 }
  0xf6   :  { %v105_v28 = vpop.f32.mrb[0].mxu0 }
  0xf7   :  { %v106_v29 = vadd.f32 %v125_v27, %v105_v28  ;;  %v177_v30 = vpop.f32.mrb[1].mxu0 }
  0xf9   :  { %110 = vst.msk [vmem:[#allocation2] sm:$0x3] %vm109_vm1, %v106_v29 }
  0xfa   :  { %217 = shalt.err (!%p214_p4)
}
  0xfb   :  { %s218_s24 = scalar_lea.hbm %s323_s3, 32 }
  0xfc   :  { %p219_p5 = scmp.ne.s32.totalorder %s323_s3, %s218_s24  ;;  %p222_p6 = scmp.lt.u32.totalorder %s218_s24, %s323_s3 }
  0xfe   :  { %p224_p7 = pnand %p222_p6, %p219_p5 }
 0x100   :  { %227 = shalt.err (!%p224_p7)
}
 0x101   :  { %120 = dma.vmem_to_hbm [thread:$0]  %s118_s22, 32, %s323_s3, [#allocation3]  }
 0x102   :  { %228 = dma.done.wait [#allocation3], 32  }
 0x103   :  { %229 = vsyncadd [#allocation3], 4294967264 }
 0x104   :  { %124 = vsyncpa [#allocation3], 1 }

</bundles_post_ra>
